<compile_context>
chip_gen: v7x
topology: tpu7x:2x2x1
jax: 0.10.0
libtpu: 0.0.40
codegen_flags: <defaults>
</compile_context>

<pallas_src>
import functools
from typing import NamedTuple

import jax
import jax.numpy as jnp
from jax import lax
from jax.experimental import pallas as pl
from jax.experimental.pallas import tpu as pltpu

# Contract last dim of LHS with last dim of RHS (x @ Y^T, no materialized T).
_DN = (((1,), (1,)), ((), ()))


# ----------------------------------------------------------------------------
# Kernels
# ----------------------------------------------------------------------------
def _sorsa_body(x_ref, w_ref, bias_ref, a_ref, s_ref, b_ref, o_ref,
                acc_ref, xa_ref, *, acc_is_out):
    j = pl.program_id(1)
    k = pl.program_id(2)

    x = x_ref[...]                                   # (tm, tk), native dtype
    base = lax.dot_general(x, w_ref[...], _DN,
                           preferred_element_type=jnp.float32)      # (tm, tn)

    # First K step: assign (fused with the bias add) instead of zero+add.
    @pl.when(k == 0)
    def _():
        acc_ref[...] = base + bias_ref[...]

    @pl.when(k > 0)
    def _():
        acc_ref[...] += base

    # Adapter stage 1: x @ A^T depends only on (i, k). Compute it once per
    # i-tile (j == 0) and reuse the persisted scratch for j > 0.
    @pl.when(j == 0)
    def _():
        xa = lax.dot_general(x, a_ref[...], _DN,
                             preferred_element_type=jnp.float32)    # (tm, r)

        @pl.when(k == 0)
        def _():
            xa_ref[...] = xa

        @pl.when(k > 0)
        def _():
            xa_ref[...] += xa

    @pl.when(k == pl.num_programs(2) - 1)
    def _():
        # scaling already folded into S in prepare. Cast the rank-r
        # activations to the adapter dtype for the MXU (tiny rounding of the
        # adapter path when adapters are bf16).
        xa_s = xa_ref[...] * s_ref[...]                              # (tm, r)
        delta = lax.dot_general(xa_s.astype(b_ref.dtype), b_ref[...], _DN,
                                preferred_element_type=jnp.float32)  # (tm, tn)
        if acc_is_out:
            o_ref[...] += delta
        else:
            o_ref[...] = (acc_ref[...] + delta).astype(o_ref.dtype)


def _sorsa_kernel_sep_acc(x_ref, w_ref, bias_ref, a_ref, s_ref, b_ref,
                          o_ref, acc_ref, xa_ref):
    _sorsa_body(x_ref, w_ref, bias_ref, a_ref, s_ref, b_ref, o_ref,
                acc_ref, xa_ref, acc_is_out=False)


def _sorsa_kernel_out_acc(x_ref, w_ref, bias_ref, a_ref, s_ref, b_ref,
                          o_ref, xa_ref):
    # f32 output: accumulate directly into o_ref (block index constant over k).
    _sorsa_body(x_ref, w_ref, bias_ref, a_ref, s_ref, b_ref, o_ref,
                o_ref, xa_ref, acc_is_out=True)


# ----------------------------------------------------------------------------
# Tile selection
# ----------------------------------------------------------------------------
def _round_up(v, m):
    return ((v + m - 1) // m) * m


@functools.lru_cache(maxsize=None)
def _device_tile_config():
    try:
        kind = jax.devices()[0].device_kind.lower()
    except Exception:
        kind = ""
    if "v5" in kind:
        # v5e ridge ~240 flop/byte: tm=tn=512 already compute-bound; keep tk
        # large to amortize the acc read-modify-write (single vst slot).
        cfg = dict(tm=512, tn=512, tk=1024, pad_grain=128, vmem_limit=64 << 20)
    elif "v6" in kind:
        # v6e ridge ~650-700 flop/byte: larger output tiles, smaller tk.
        cfg = dict(tm=512, tn=1024, tk=512, pad_grain=256, vmem_limit=64 << 20)
    elif "v7" in kind or "7x" in kind:
        # v7x: similar ridge but only 64 MiB VMEM/TC -> tighter scoped budget.
        cfg = dict(tm=1024, tn=2048, tk=512, pad_grain=256, vmem_limit=48 << 20)
    else:
        cfg = dict(tm=512, tn=1024, tk=512, pad_grain=256, vmem_limit=48 << 20)
    try:  # Cap the scoped-VMEM request by what the chip actually has.
        cap = pltpu.get_tpu_info().vmem_capacity_bytes
        cfg["vmem_limit"] = min(cfg["vmem_limit"], int(cap * 0.75))
    except Exception:
        pass
    return cfg


def _divisor_tile(dim, desired):
    """Largest multiple of 128 that divides `dim` (a multiple of 128) and is
    <= desired. Avoids tiles that force padding the weight / wasting MXU work
    on zeros (e.g. K=11008 -> tk=256 with no pad at all)."""
    q = dim // 128
    best = 1
    for d in range(1, q + 1):
        if q % d == 0 and d * 128 <= desired:
            best = d
    return best * 128


def _vmem_bytes(tm, tn, tk, r_pad, in_bytes, out_bytes, separate_acc):
    buf = 2 * (tm * tk + tn * tk + r_pad * tk + tn * r_pad) * in_bytes  # x,W,A,B (dbl-buffered)
    buf += 2 * tm * tn * out_bytes                                      # output (dbl-buffered)
    buf += tm * r_pad * 4                                               # x@A^T accumulator
    buf += 2 * (tn + r_pad) * 4                                         # bias, S
    if separate_acc:
        buf += tm * tn * 4                                              # f32 base accumulator
    return buf


def _fit_tiles(tm, K_pad, N_pad, r_pad, tn_des, tk_des,
               in_bytes, out_bytes, separate_acc, budget):
    tk = _divisor_tile(K_pad, tk_des)
    tn = _divisor_tile(N_pad, tn_des)
    while _vmem_bytes(tm, tn, tk, r_pad, in_bytes, out_bytes, separate_acc) > budget:
        if tk > 256 and tk >= tn:
            tk = _divisor_tile(K_pad, tk // 2)
        elif tn > 256:
            tn = _divisor_tile(N_pad, tn // 2)
        elif tk > 128:
            tk = _divisor_tile(K_pad, tk // 2)
        elif tn > 128:
            tn = _divisor_tile(N_pad, tn // 2)
        elif tm > 8:
            tm = max(8, _round_up(tm // 2, 8))
        else:
            break
    return tm, tn, tk


# ----------------------------------------------------------------------------
# One-time (init-time) packing + per-call wrapper
# ----------------------------------------------------------------------------
class SorsaLinearParams(NamedTuple):
    w: jax.Array        # (N_pad, K_pad) residual weight
    bias: jax.Array     # (1, N_pad) float32
    a: jax.Array        # (r_pad, K_pad)
    s: jax.Array        # (1, r_pad) float32, scaling folded in
    b: jax.Array        # (N_pad, r_pad)
    out_features: int
    in_features: int


def prepare_sorsa_linear(weight, bias, sorsa_A, sorsa_S, sorsa_B, scaling):
    """One-time packing: pad weight-like operands to the tile grain and fold
    `scaling` into S, so the per-call hot path never re-pads the full weight."""
    grain = _device_tile_config()["pad_grain"]
    out_features, in_features = weight.shape
    r = sorsa_A.shape[0]

    K_pad = _round_up(in_features, grain)
    N_pad = _round_up(out_features, grain)
    r_pad = _round_up(r, 8)

    w = jnp.pad(weight, ((0, N_pad - out_features), (0, K_pad - in_features)))
    a = jnp.pad(sorsa_A, ((0, r_pad - r), (0, K_pad - in_features)))
    b = jnp.pad(sorsa_B, ((0, N_pad - out_features), (0, r_pad - r)))
    s = sorsa_S.astype(jnp.float32) * jnp.float32(scaling)
    s = jnp.pad(s, (0, r_pad - r)).reshape(1, r_pad)
    if bias is None:
        bias2 = jnp.zeros((1, N_pad), jnp.float32)
    else:
        bias2 = jnp.pad(bias.astype(jnp.float32),
                        (0, N_pad - out_features)).reshape(1, N_pad)
    return SorsaLinearParams(w, bias2, a, s, b, out_features, in_features)


def sorsa_linear(params: SorsaLinearParams, x):
    """x: (..., in_features) -> (..., out_features)."""
    cfg = _device_tile_config()
    out_features, in_features = params.out_features, params.in_features
    N_pad, K_pad = params.w.shape
    r_pad = params.a.shape[0]

    orig_shape = x.shape
    xm = x.reshape(-1, in_features)
    M = xm.shape[0]

    out_dtype = x.dtype
    acc_is_out = out_dtype == jnp.float32
    in_bytes = x.dtype.itemsize
    out_bytes = jnp.dtype(out_dtype).itemsize

    tm_des, tn_des, tk_des = cfg["tm"], cfg["tn"], cfg["tk"]
    # Small-M (decode / GEMV) regime is pure weight-bandwidth bound: maximize
    # tn and keep tk large so W streams through in few, big grid steps.
    # (If profiling still shows DMA gaps here, pl.Buffered(3) on the W spec
    # is the next lever.)
    if _round_up(M, 8) <= 256:
        tn_des = max(tn_des, 2048)
        tk_des = max(tk_des, 1024)
    # tm_des is a multiple of 256 on v6e/v7x (MXU height); the small-M clamp
    # trades MXU fill for less row padding.
    tm = min(tm_des, _round_up(M, 8))

    budget = int(cfg["vmem_limit"] * 0.85)
    tm, tn, tk = _fit_tiles(tm, K_pad, N_pad, r_pad, tn_des, tk_des,
                            in_bytes, out_bytes, not acc_is_out, budget)

    M_pad = _round_up(M, tm)
    if (M_pad, K_pad) != (M, in_features):
        xm = jnp.pad(xm, ((0, M_pad - M), (0, K_pad - in_features)))

    grid = (M_pad // tm, N_pad // tn, K_pad // tk)

    if acc_is_out:
        kernel = _sorsa_kernel_out_acc
        scratch = [pltpu.VMEM((tm, r_pad), jnp.float32)]            # x@A^T acc
    else:
        kernel = _sorsa_kernel_sep_acc
        scratch = [pltpu.VMEM((tm, tn), jnp.float32),               # base acc
                   pltpu.VMEM((tm, r_pad), jnp.float32)]            # x@A^T acc

    out = pl.pallas_call(
        kernel,
        out_shape=jax.ShapeDtypeStruct((M_pad, N_pad), out_dtype),
        grid_spec=pltpu.PrefetchScalarGridSpec(
            num_scalar_prefetch=0,
            grid=grid,
            in_specs=[
                pl.BlockSpec((tm, tk), lambda i, j, k: (i, k)),      # x
                pl.BlockSpec((tn, tk), lambda i, j, k: (j, k)),      # W (out, in)
                pl.BlockSpec((1, tn), lambda i, j, k: (0, j)),       # bias (f32)
                pl.BlockSpec((r_pad, tk), lambda i, j, k: (0, k)),   # A (r, in)
                pl.BlockSpec((1, r_pad), lambda i, j, k: (0, 0)),    # scaled S
                pl.BlockSpec((tn, r_pad), lambda i, j, k: (j, 0)),   # B (out, r)
            ],
            out_specs=pl.BlockSpec((tm, tn), lambda i, j, k: (i, j)),
            scratch_shapes=scratch,
        ),
        compiler_params=pltpu.CompilerParams(
            # j and k must stay "arbitrary": the x@A^T scratch computed at
            # j == 0 is reused for j > 0, and k carries the accumulation.
            dimension_semantics=("parallel", "arbitrary", "arbitrary"),
            vmem_limit_bytes=cfg["vmem_limit"],
        ),
    )(xm, params.w, params.bias, params.a, params.s, params.b)

    out = out[:M, :out_features]
    return out.reshape(*orig_shape[:-1], out_features)


# ----------------------------------------------------------------------------
# Demo / correctness check
# ----------------------------------------------------------------------------
if __name__ == "__main__":
    batch, seq = 2, 8
    in_features, out_features = 32, 64
    r, sorsa_alpha = 8, 16
    scaling = sorsa_alpha / r

    key = jax.random.PRNGKey(0)
    k_x, k_w, k_b = jax.random.split(key, 3)

    x = jax.random.normal(k_x, (batch, seq, in_features), dtype=jnp.float32)
    w0 = jax.random.normal(k_w, (out_features, in_features), dtype=jnp.float32) * 0.1
    bias = jax.random.normal(k_b, (out_features,), dtype=jnp.float32) * 0.1

    # SORSA init (mirrors sorsa_init): SVD of the base weight, keep top-r
    # factors, subtract the scaled low-rank part from the base weight.
    u, s, vt = jnp.linalg.svd(w0, full_matrices=False)
    sorsa_A = vt[:r, :]                      # (r, in)
    sorsa_S = s[:r]                          # (r,)
    sorsa_B = u[:, :r]                       # (out, r)
    w_res = w0 - scaling * (sorsa_B @ jnp.diag(sorsa_S) @ sorsa_A)

    # --- float32 path (direct accumulation into the output block) ---
    params = prepare_sorsa_linear(w_res, bias, sorsa_A, sorsa_S, sorsa_B, scaling)
    out = jax.block_until_ready(sorsa_linear(params, x))

    ref = x @ w_res.T + bias
    ref = ref + scaling * (x @ (sorsa_B @ jnp.diag(sorsa_S) @ sorsa_A).T)

    assert out.shape == (batch, seq, out_features)
    assert jnp.allclose(out, ref, atol=1e-4, rtol=1e-4), "f32 mismatch vs reference"

    # --- bfloat16 path (intended deployment dtype; separate f32 accumulator) ---
    xb = x.astype(jnp.bfloat16)
    params_bf16 = prepare_sorsa_linear(
        w_res.astype(jnp.bfloat16), bias, sorsa_A.astype(jnp.bfloat16),
        sorsa_S, sorsa_B.astype(jnp.bfloat16), scaling)
    out_bf16 = jax.block_until_ready(sorsa_linear(params_bf16, xb))

    xf = xb.astype(jnp.float32)
    wb = w_res.astype(jnp.bfloat16).astype(jnp.float32)
    ab = sorsa_A.astype(jnp.bfloat16).astype(jnp.float32)
    bb = sorsa_B.astype(jnp.bfloat16).astype(jnp.float32)
    ref_b = xf @ wb.T + bias + scaling * (((xf @ ab.T) * sorsa_S) @ bb.T)
    assert out_bf16.shape == (batch, seq, out_features)
    assert jnp.allclose(out_bf16.astype(jnp.float32), ref_b, atol=1e-1, rtol=1e-1), \
        "bf16 mismatch vs reference"

    print("KERNEL_OK")
</pallas_src>

<mosaic_0001>
module attributes {stable_mosaic.version = 11 : i64} {
  func.func @_sorsa_kernel_out_acc(%arg0: i32, %arg1: i32, %arg2: i32, %arg3: memref<16x256xf32, #tpu.memory_space<vmem>>, %arg4: memref<256x256xf32, #tpu.memory_space<vmem>>, %arg5: memref<1x256xf32, #tpu.memory_space<vmem>>, %arg6: memref<8x256xf32, #tpu.memory_space<vmem>>, %arg7: memref<1x8xf32, #tpu.memory_space<vmem>>, %arg8: memref<256x8xf32, #tpu.memory_space<vmem>>, %arg9: memref<16x256xf32, #tpu.memory_space<vmem>>, %arg10: memref<16x8xf32, #tpu.memory_space<vmem>>) attributes {dimension_semantics = [#tpu.dimension_semantics<parallel>, #tpu.dimension_semantics<arbitrary>, #tpu.dimension_semantics<arbitrary>], iteration_bounds = array<i64: 1, 1, 1>, scalar_prefetch = 0 : i64, scratch_operands = 1 : i64, tpu.core_type = #tpu.core_type<tc>, window_params = [{transform_indices = @transform_0, window_bounds = array<i64: 16, 256>}, {transform_indices = @transform_1, window_bounds = array<i64: 256, 256>}, {transform_indices = @transform_2, window_bounds = array<i64: 1, 256>}, {transform_indices = @transform_3, window_bounds = array<i64: 8, 256>}, {pipeline_mode = #tpu.pipeline_mode<synchronous>, transform_indices = @transform_4, window_bounds = array<i64: 1, 8>}, {transform_indices = @transform_5, window_bounds = array<i64: 256, 8>}, {transform_indices = @transform_6, window_bounds = array<i64: 16, 256>}]} {
    %c0 = arith.constant 0 : index
    %c0_0 = arith.constant 0 : index
    %0 = vector.load %arg3[%c0, %c0_0] : memref<16x256xf32, #tpu.memory_space<vmem>>, vector<16x256xf32>
    %c0_1 = arith.constant 0 : index
    %c0_2 = arith.constant 0 : index
    %1 = vector.load %arg4[%c0_1, %c0_2] : memref<256x256xf32, #tpu.memory_space<vmem>>, vector<256x256xf32>
    %cst = arith.constant dense<0.000000e+00> : vector<16x256xf32>
    %2 = tpu.matmul %0, %1, %cst {dimension_numbers = #tpu.dot_dimension_numbers<[1], [1], [0], [0], [0, 0, 1, 0], [], []>} : vector<16x256xf32>, vector<256x256xf32>, vector<16x256xf32> -> vector<16x256xf32>
    %c0_i32 = arith.constant 0 : i32
    %3 = arith.cmpi eq, %arg2, %c0_i32 : i32
    %4 = arith.extui %3 : i1 to i32
    %c0_i32_3 = arith.constant 0 : i32
    %5 = arith.cmpi ne, %4, %c0_i32_3 : i32
    scf.if %5 {
      %c0_10 = arith.constant 0 : index
      %c0_11 = arith.constant 0 : index
      %15 = vector.load %arg5[%c0_10, %c0_11] : memref<1x256xf32, #tpu.memory_space<vmem>>, vector<1x256xf32>
      %16 = vector.broadcast %15 : vector<1x256xf32> to vector<16x256xf32>
      %17 = arith.addf %2, %16 : vector<16x256xf32>
      %c0_12 = arith.constant 0 : index
      %c0_13 = arith.constant 0 : index
      %18 = vector.load %arg9[%c0_12, %c0_13] : memref<16x256xf32, #tpu.memory_space<vmem>>, vector<16x256xf32>
      tpu.vector_store %arg9[%c0_12, %c0_13], %17 {strides = array<i32>} : memref<16x256xf32, #tpu.memory_space<vmem>>, vector<16x256xf32>,
    } else {
    }
    %c0_i32_4 = arith.constant 0 : i32
    %6 = arith.cmpi sgt, %arg2, %c0_i32_4 : i32
    %7 = arith.extui %6 : i1 to i32
    %c0_i32_5 = arith.constant 0 : i32
    %8 = arith.cmpi ne, %7, %c0_i32_5 : i32
    scf.if %8 {
      %c0_10 = arith.constant 0 : index
      %c0_11 = arith.constant 0 : index
      %15 = vector.load %arg9[%c0_10, %c0_11] : memref<16x256xf32, #tpu.memory_space<vmem>>, vector<16x256xf32>
      %16 = arith.addf %15, %2 : vector<16x256xf32>
      %c0_12 = arith.constant 0 : index
      %c0_13 = arith.constant 0 : index
      %17 = vector.load %arg9[%c0_12, %c0_13] : memref<16x256xf32, #tpu.memory_space<vmem>>, vector<16x256xf32>
      tpu.vector_store %arg9[%c0_12, %c0_13], %16 {strides = array<i32>} : memref<16x256xf32, #tpu.memory_space<vmem>>, vector<16x256xf32>,
    } else {
    }
    %c0_i32_6 = arith.constant 0 : i32
    %9 = arith.cmpi eq, %arg1, %c0_i32_6 : i32
    %10 = arith.extui %9 : i1 to i32
    %c0_i32_7 = arith.constant 0 : i32
    %11 = arith.cmpi ne, %10, %c0_i32_7 : i32
    scf.if %11 {
      %c0_10 = arith.constant 0 : index
      %c0_11 = arith.constant 0 : index
      %15 = vector.load %arg6[%c0_10, %c0_11] : memref<8x256xf32, #tpu.memory_space<vmem>>, vector<8x256xf32>
      %cst_12 = arith.constant dense<0.000000e+00> : vector<16x8xf32>
      %16 = tpu.matmul %0, %15, %cst_12 {dimension_numbers = #tpu.dot_dimension_numbers<[1], [1], [0], [0], [0, 0, 1, 0], [], []>} : vector<16x256xf32>, vector<8x256xf32>, vector<16x8xf32> -> vector<16x8xf32>
      %c0_i32_13 = arith.constant 0 : i32
      %17 = arith.cmpi eq, %arg2, %c0_i32_13 : i32
      %18 = arith.extui %17 : i1 to i32
      %c0_i32_14 = arith.constant 0 : i32
      %19 = arith.cmpi ne, %18, %c0_i32_14 : i32
      scf.if %19 {
        %c0_17 = arith.constant 0 : index
        %c0_18 = arith.constant 0 : index
        %23 = vector.load %arg10[%c0_17, %c0_18] : memref<16x8xf32, #tpu.memory_space<vmem>>, vector<16x8xf32>
        tpu.vector_store %arg10[%c0_17, %c0_18], %16 {strides = array<i32>} : memref<16x8xf32, #tpu.memory_space<vmem>>, vector<16x8xf32>,
      } else {
      }
      %c0_i32_15 = arith.constant 0 : i32
      %20 = arith.cmpi sgt, %arg2, %c0_i32_15 : i32
      %21 = arith.extui %20 : i1 to i32
      %c0_i32_16 = arith.constant 0 : i32
      %22 = arith.cmpi ne, %21, %c0_i32_16 : i32
      scf.if %22 {
        %c0_17 = arith.constant 0 : index
        %c0_18 = arith.constant 0 : index
        %23 = vector.load %arg10[%c0_17, %c0_18] : memref<16x8xf32, #tpu.memory_space<vmem>>, vector<16x8xf32>
        %24 = arith.addf %23, %16 : vector<16x8xf32>
        %c0_19 = arith.constant 0 : index
        %c0_20 = arith.constant 0 : index
        %25 = vector.load %arg10[%c0_19, %c0_20] : memref<16x8xf32, #tpu.memory_space<vmem>>, vector<16x8xf32>
        tpu.vector_store %arg10[%c0_19, %c0_20], %24 {strides = array<i32>} : memref<16x8xf32, #tpu.memory_space<vmem>>, vector<16x8xf32>,
      } else {
      }
    } else {
    }
    %c0_i32_8 = arith.constant 0 : i32
    %12 = arith.cmpi eq, %arg2, %c0_i32_8 : i32
    %13 = arith.extui %12 : i1 to i32
    %c0_i32_9 = arith.constant 0 : i32
    %14 = arith.cmpi ne, %13, %c0_i32_9 : i32
    scf.if %14 {
      %c0_10 = arith.constant 0 : index
      %c0_11 = arith.constant 0 : index
      %15 = vector.load %arg10[%c0_10, %c0_11] : memref<16x8xf32, #tpu.memory_space<vmem>>, vector<16x8xf32>
      %c0_12 = arith.constant 0 : index
      %c0_13 = arith.constant 0 : index
      %16 = vector.load %arg7[%c0_12, %c0_13] : memref<1x8xf32, #tpu.memory_space<vmem>>, vector<1x8xf32>
      %17 = vector.broadcast %16 : vector<1x8xf32> to vector<16x8xf32>
      %18 = arith.mulf %15, %17 : vector<16x8xf32>
      %c0_14 = arith.constant 0 : index
      %c0_15 = arith.constant 0 : index
      %19 = vector.load %arg8[%c0_14, %c0_15] : memref<256x8xf32, #tpu.memory_space<vmem>>, vector<256x8xf32>
      %cst_16 = arith.constant dense<0.000000e+00> : vector<16x256xf32>
      %20 = tpu.matmul %18, %19, %cst_16 {dimension_numbers = #tpu.dot_dimension_numbers<[1], [1], [0], [0], [0, 0, 1, 0], [], []>} : vector<16x8xf32>, vector<256x8xf32>, vector<16x256xf32> -> vector<16x256xf32>
      %c0_17 = arith.constant 0 : index
      %c0_18 = arith.constant 0 : index
      %21 = vector.load %arg9[%c0_17, %c0_18] : memref<16x256xf32, #tpu.memory_space<vmem>>, vector<16x256xf32>
      %22 = arith.addf %21, %20 : vector<16x256xf32>
      %c0_19 = arith.constant 0 : index
      %c0_20 = arith.constant 0 : index
      %23 = vector.load %arg9[%c0_19, %c0_20] : memref<16x256xf32, #tpu.memory_space<vmem>>, vector<16x256xf32>
      tpu.vector_store %arg9[%c0_19, %c0_20], %22 {strides = array<i32>} : memref<16x256xf32, #tpu.memory_space<vmem>>, vector<16x256xf32>,
    } else {
    }
    return
  }
  func.func @transform_0(%arg0: i32, %arg1: i32, %arg2: i32) -> (i32, i32) {
    %c0_i32 = arith.constant 0 : i32
    return %arg0, %arg2 : i32, i32
  }
  func.func @transform_1(%arg0: i32, %arg1: i32, %arg2: i32) -> (i32, i32) {
    %c0_i32 = arith.constant 0 : i32
    return %arg1, %arg2 : i32, i32
  }
  func.func @transform_2(%arg0: i32, %arg1: i32, %arg2: i32) -> (i32, i32) {
    %c0_i32 = arith.constant 0 : i32
    %c0_i32_0 = arith.constant 0 : i32
    return %c0_i32, %arg1 : i32, i32
  }
  func.func @transform_3(%arg0: i32, %arg1: i32, %arg2: i32) -> (i32, i32) {
    %c0_i32 = arith.constant 0 : i32
    %c0_i32_0 = arith.constant 0 : i32
    return %c0_i32, %arg2 : i32, i32
  }
  func.func @transform_4(%arg0: i32, %arg1: i32, %arg2: i32) -> (i32, i32) {
    %c0_i32 = arith.constant 0 : i32
    %c0_i32_0 = arith.constant 0 : i32
    %c0_i32_1 = arith.constant 0 : i32
    return %c0_i32, %c0_i32_0 : i32, i32
  }
  func.func @transform_5(%arg0: i32, %arg1: i32, %arg2: i32) -> (i32, i32) {
    %c0_i32 = arith.constant 0 : i32
    %c0_i32_0 = arith.constant 0 : i32
    return %arg1, %c0_i32 : i32, i32
  }
  func.func @transform_6(%arg0: i32, %arg1: i32, %arg2: i32) -> (i32, i32) {
    %c0_i32 = arith.constant 0 : i32
    return %arg0, %arg1 : i32, i32
  }
}

</mosaic_0001>

<bundles_post_ra>
// kernel: tpu_custom_call.1
= control target key start
LH: loop header
LB: loop body
LE: loop exit
PB: predicated region body
PF: predicated region fallthrough
CT: control target
= control target key end

     0   :  { %11 = vsyncpa [#allocation4], 0  ;;  %s1071_s0 = inlined_call_operand.vmem [shape: f32[16,256], index: 0, kind: input, shape index: {}]   ;;  %s1072_s1 = inlined_call_operand.hbm [shape: f32[256,256], index: 1, kind: input, shape index: {}]   ;;  %s1073_s2 = inlined_call_operand.vmem [shape: f32[1,256], index: 2, kind: input, shape index: {}]   ;;  %s1074_s3 = inlined_call_operand.vmem [shape: f32[8,256], index: 3, kind: input, shape index: {}]   ;;  %s1075_s4 = inlined_call_operand.vmem [shape: f32[1,8], index: 4, kind: input, shape index: {}]   ;;  %s1076_s5 = inlined_call_operand.vmem [shape: f32[256,8], index: 5, kind: input, shape index: {}]   ;;  %s1077_s6 = inlined_call_operand.hbm [shape: f32[16,256], index: 6, kind: output, shape index: {}]  }
   0x1   :  { %12 = vsyncpa [#allocation5], 0  ;;  %s826_s21 = smov [#allocation3]   ;;  %s778_s25 = scalar_lea.hbm %s1072_s1, 8192 }
   0x2   :  { %s20_s22 = sshll.u32 %s826_s21, 4  ;;  %p779_p0 = scmp.ne.s32.totalorder %s1072_s1, %s778_s25  ;;  %s21_s22 = int_to_ptr.vmem [resolvable:$true] %s20_s22 }
   0x3   :  { %p782_p1 = scmp.lt.u32.totalorder %s778_s25, %s1072_s1 }
   0x5   :  { %p784_p2 = pnand %p782_p1, %p779_p0 }
   0x7   :  { %787 = shalt.err (!%p784_p2)
}
   0x8   :  { %s788_s30 = scalar_lea.vmem %s21_s22, 8192  ;;  %p793_p4 = scmp.lt.s32.totalorder %s21_s22, %s21_s22 }
   0x9   :  { %p789_p3 = scmp.ne.s32.totalorder %s21_s22, %s788_s30  ;;  %p794_p5 = scmp.lt.s32.totalorder %s788_s30, %s788_s30 }
   0xb   :  { %p795_p6 = por %p794_p5, %p793_p4 }
   0xd   :  { %p796_p7 = pnand %p795_p6, %p789_p3 }
   0xf   :  { %799 = shalt.err (!%p796_p7)
}
  0x10   :  { %s827_s7 = smov 256   ;;  %s828_s8 = smov 16  }
  0x11   :  { %26 = dma.hbm_to_vmem [thread:$0]  %s1072_s1, 8192, %s21_s22, [#allocation4], %s827_s7, %s827_s7, %s828_s8  }
  0x12   :  { %822 = dma.done.wait [#allocation4], 8192  }
  0x13   :  { %823 = vsyncadd [#allocation4], 4294959104  ;;  %v228_v0 = vld [vmem:[%s1074_s3 + $0x8] sm:$0xff]  ;;  %v227_v1 = vld [vmem:[%s1074_s3] sm:$0xff]  ;;  %vm307_vm0 = vcmask 64512   ;;  %s829_s14 = smov [#allocation6]  }
  0x14   :  { %v39_v2 = vld [vmem:[%s1071_s0 + $0x8] sm:$0xff]  ;;  %229 = vmatprep.subr.mxu1 %v228_v0  ;;  %v892_v3 = vld [vmem:[%s1071_s0] sm:$0xff]  ;;  %v897_v4 = vld [vmem:[%s1071_s0 + $0x18] sm:$0xff]  ;;  %s563_s15 = sshll.u32 %s829_s14, 4  ;;  %s564_s15 = int_to_ptr.vmem [resolvable:$true] %s563_s15 }
  0x15   :  { %293 = vmatprep.mubr.f32.mxu1 %v39_v2  ;;  %230 = vmatpush1.xpose.msra.mxu1 %v227_v1  ;;  %v43_v5 = vld [vmem:[#allocation3 + $0x8] sm:$0xff]  ;;  %v45_v6 = vld [vmem:[#allocation3 + $0x18] sm:$0xff]  ;;  %v42_v7 = vld [vmem:[#allocation3] sm:$0xff]  ;;  %p805_p9 = scmp.lt.s32.totalorder %s564_s15, %s564_s15 }
  0x16   :  { %170 = vmatprep.mubr.f32.mxu0 %v39_v2  ;;  %v646_v8 = vpack.c.bf16 %v45_v6, %v43_v5  ;;  %v44_v9 = vld [vmem:[#allocation3 + $0x10] sm:$0xff]  ;;  %v47_v10 = vld [vmem:[#allocation3 + $0x28] sm:$0xff]  ;;  %v49_v11 = vld [vmem:[#allocation3 + $0x38] sm:$0xff] }
  0x17   :  { %v648_v12 = vpack.c.bf16 %v44_v9, %v42_v7  ;;  %v650_v13 = vpack.c.bf16 %v49_v11, %v47_v10  ;;  %v904_v14 = vld [vmem:[%s1071_s0 + $0x10] sm:$0xff]  ;;  %v48_v16 = vld [vmem:[#allocation3 + $0x30] sm:$0xff]  ;;  %v51_v17 = vld [vmem:[#allocation3 + $0x48] sm:$0xff] }
  0x18   :  { %294 = vmatmul.mubr.f32.vlgmr.msra.gmra.mrb[0].mxu1 %v892_v3  ;;  %647 = vmatprep.subr.bf16.mxu0 %v646_v8  ;;  %v46_v15 = vld [vmem:[#allocation3 + $0x20] sm:$0xff]  ;;  %v53_v18 = vld [vmem:[#allocation3 + $0x58] sm:$0xff]  ;;  %v52_v22 = vld [vmem:[#allocation3 + $0x50] sm:$0xff] }
  0x19   :  { %298 = vmatprep.mubr.f32.mxu1 %v897_v4  ;;  %649 = vmatpush1.bf16.xpose.msra.mxu0 %v648_v12  ;;  %v652_v19 = vpack.c.bf16 %v48_v16, %v46_v15  ;;  %v654_v20 = vpack.c.bf16 %v53_v18, %v51_v17  ;;  %v50_v21 = vld [vmem:[#allocation3 + $0x40] sm:$0xff]  ;;  %vm909_vm1 = vmpackc.low %vm307_vm0, %vm307_vm0  ;;  %v55_v24 = vld [vmem:[#allocation3 + $0x68] sm:$0xff] }
  0x1a   :  { %651 = vmatprep.subr.bf16.mxu0 %v650_v13  ;;  %v350_v25 = vld [vmem:[%s1076_s5 + $0x80] sm:$0xff]  ;;  %v351_v26 = vld [vmem:[%s1076_s5 + $0x88] sm:$0xff]  ;;  %v656_v32 = vpack.c.bf16 %v52_v22, %v50_v21  ;;  %v352_v33 = vld [vmem:[%s1076_s5 + $0x90] sm:$0xff] }
  0x1b   :  { %v57_v27 = vld [vmem:[#allocation3 + $0x78] sm:$0xff]  ;;  %v710_v28 = vpack.c.bf16 %v351_v26, %v350_v25  ;;  %v334_v29 = vld [vmem:[%s1076_s5] sm:$0xff]  ;;  %v353_v34 = vld [vmem:[%s1076_s5 + $0x98] sm:$0xff] }
  0x1c   :  { %299 = vmatmul.mubr.f32.gmra.mrb[2].mxu1 %v904_v14  ;;  %v335_v30 = vld [vmem:[%s1076_s5 + $0x8] sm:$0xff]  ;;  %v658_v35 = vpack.c.bf16 %v57_v27, %v55_v24  ;;  %v716_v36 = vpack.c.bf16 %v353_v34, %v352_v33  ;;  %v336_v37 = vld [vmem:[%s1076_s5 + $0x10] sm:$0xff]  ;;  %v337_v38 = vld [vmem:[%s1076_s5 + $0x18] sm:$0xff] }
  0x1d   :  { %v713_v31 = vpack.c.bf16 %v335_v30, %v334_v29  ;;  %712 = vmatprep.subr.msk.bf16.mxu1 %vm909_vm1, %v710_v28  ;;  %v354_v39 = vld [vmem:[%s1076_s5 + $0xa0] sm:$0xff]  ;;  %v355_v40 = vld [vmem:[%s1076_s5 + $0xa8] sm:$0xff]  ;;  %v54_v41 = vld [vmem:[#allocation3 + $0x60] sm:$0xff]  ;;  %v719_v43 = vpack.c.bf16 %v337_v38, %v336_v37 }
  0x1e   :  { %v56_v42 = vld [vmem:[#allocation3 + $0x70] sm:$0xff]  ;;  %v59_v44 = vld [vmem:[#allocation3 + $0x88] sm:$0xff]  ;;  %v61_v45 = vld [vmem:[#allocation3 + $0x98] sm:$0xff]  ;;  %v722_v46 = vpack.c.bf16 %v355_v40, %v354_v39 }
  0x1f   :  { %715 = vmatpush3.bf16.xpose.msk.msra.mxu1 %vm909_vm1, %v713_v31  ;;  %v660_v47 = vpack.c.bf16 %v56_v42, %v54_v41  ;;  %v662_v48 = vpack.c.bf16 %v61_v45, %v59_v44  ;;  %v338_v49 = vld [vmem:[%s1076_s5 + $0x20] sm:$0xff]  ;;  %v339_v50 = vld [vmem:[%s1076_s5 + $0x28] sm:$0xff]  ;;  %v356_v51 = vld [vmem:[%s1076_s5 + $0xb0] sm:$0xff] }
  0x20   :  { %718 = vmatprep.subr.msk.bf16.mxu1 %vm909_vm1, %v716_v36  ;;  %v357_v52 = vld [vmem:[%s1076_s5 + $0xb8] sm:$0xff]  ;;  %v58_v53 = vld [vmem:[#allocation3 + $0x80] sm:$0xff]  ;;  %v60_v54 = vld [vmem:[#allocation3 + $0x90] sm:$0xff]  ;;  %v725_v55 = vpack.c.bf16 %v339_v50, %v338_v49 }
  0x21   :  { %653 = vmatpush1.bf16.xpose.msra.mxu0 %v652_v19  ;;  %v63_v56 = vld [vmem:[#allocation3 + $0xa8] sm:$0xff]  ;;  %v65_v57 = vld [vmem:[#allocation3 + $0xb8] sm:$0xff]  ;;  %v728_v58 = vpack.c.bf16 %v357_v52, %v356_v51  ;;  %v664_v59 = vpack.c.bf16 %v60_v54, %v58_v53  ;;  %v340_v61 = vld [vmem:[%s1076_s5 + $0x30] sm:$0xff] }
  0x22   :  { %655 = vmatprep.subr.bf16.mxu0 %v654_v20  ;;  %v666_v60 = vpack.c.bf16 %v65_v57, %v63_v56  ;;  %v341_v62 = vld [vmem:[%s1076_s5 + $0x38] sm:$0xff]  ;;  %v358_v63 = vld [vmem:[%s1076_s5 + $0xc0] sm:$0xff]  ;;  %v359_v0 = vld [vmem:[%s1076_s5 + $0xc8] sm:$0xff] }
  0x23   :  { %v62_v1 = vld [vmem:[#allocation3 + $0xa0] sm:$0xff]  ;;  %v64_v2 = vld [vmem:[#allocation3 + $0xb0] sm:$0xff]  ;;  %v731_v5 = vpack.c.bf16 %v341_v62, %v340_v61  ;;  %v67_v6 = vld [vmem:[#allocation3 + $0xc8] sm:$0xff]  ;;  %v734_v8 = vpack.c.bf16 %v359_v0, %v358_v63 }
  0x24   :  { %v69_v7 = vld [vmem:[#allocation3 + $0xd8] sm:$0xff]  ;;  %v668_v9 = vpack.c.bf16 %v64_v2, %v62_v1  ;;  %v342_v11 = vld [vmem:[%s1076_s5 + $0x40] sm:$0xff]  ;;  %v360_v13 = vld [vmem:[%s1076_s5 + $0xd0] sm:$0xff] }
  0x25   :  { %v670_v10 = vpack.c.bf16 %v69_v7, %v67_v6  ;;  %v343_v12 = vld [vmem:[%s1076_s5 + $0x48] sm:$0xff]  ;;  %v361_v15 = vld [vmem:[%s1076_s5 + $0xd8] sm:$0xff]  ;;  %v66_v16 = vld [vmem:[#allocation3 + $0xc0] sm:$0xff] }
  0x26   :  { %v68_v17 = vld [vmem:[#allocation3 + $0xd0] sm:$0xff]  ;;  %v737_v18 = vpack.c.bf16 %v343_v12, %v342_v11  ;;  %v71_v19 = vld [vmem:[#allocation3 + $0xe8] sm:$0xff]  ;;  %v73_v20 = vld [vmem:[#allocation3 + $0xf8] sm:$0xff]  ;;  %v740_v21 = vpack.c.bf16 %v361_v15, %v360_v13 }
  0x27   :  { %721 = vmatpush3.bf16.xpose.msk.msra.mxu1 %vm909_vm1, %v719_v43  ;;  %v672_v22 = vpack.c.bf16 %v68_v17, %v66_v16  ;;  %v674_v24 = vpack.c.bf16 %v73_v20, %v71_v19  ;;  %v344_v25 = vld [vmem:[%s1076_s5 + $0x50] sm:$0xff]  ;;  %v345_v26 = vld [vmem:[%s1076_s5 + $0x58] sm:$0xff]  ;;  %v362_v27 = vld [vmem:[%s1076_s5 + $0xe0] sm:$0xff] }
  0x28   :  { %724 = vmatprep.subr.msk.bf16.mxu1 %vm909_vm1, %v722_v46  ;;  %v363_v28 = vld [vmem:[%s1076_s5 + $0xe8] sm:$0xff]  ;;  %v70_v29 = vld [vmem:[#allocation3 + $0xe0] sm:$0xff]  ;;  %v72_v30 = vld [vmem:[#allocation3 + $0xf0] sm:$0xff]  ;;  %v743_v31 = vpack.c.bf16 %v345_v26, %v344_v25 }
  0x29   :  { %657 = vmatpush1.bf16.xpose.msra.mxu0 %v656_v32  ;;  %v75_v32 = vld [vmem:[#allocation3 + $0x108] sm:$0xff]  ;;  %v77_v33 = vld [vmem:[#allocation3 + $0x118] sm:$0xff]  ;;  %v746_v34 = vpack.c.bf16 %v363_v28, %v362_v27  ;;  %v346_v37 = vld [vmem:[%s1076_s5 + $0x60] sm:$0xff] }
  0x2a   :  { %659 = vmatprep.subr.bf16.mxu0 %v658_v35  ;;  %v676_v35 = vpack.c.bf16 %v72_v30, %v70_v29  ;;  %v678_v36 = vpack.c.bf16 %v77_v33, %v75_v32  ;;  %v347_v38 = vld [vmem:[%s1076_s5 + $0x68] sm:$0xff]  ;;  %v74_v39 = vld [vmem:[#allocation3 + $0x100] sm:$0xff]  ;;  %v76_v40 = vld [vmem:[#allocation3 + $0x110] sm:$0xff] }
  0x2b   :  { %v749_v41 = vpack.c.bf16 %v347_v38, %v346_v37  ;;  %v79_v42 = vld [vmem:[#allocation3 + $0x128] sm:$0xff]  ;;  %v81_v43 = vld [vmem:[#allocation3 + $0x138] sm:$0xff]  ;;  %v680_v44 = vpack.c.bf16 %v76_v40, %v74_v39  ;;  %v78_v46 = vld [vmem:[#allocation3 + $0x120] sm:$0xff]  ;;  %v189_v40 = vlaneseq }
  0x2c   :  { %v682_v45 = vpack.c.bf16 %v81_v43, %v79_v42  ;;  %v85_v49 = vld [vmem:[#allocation3 + $0x158] sm:$0xff]  ;;  %v82_v52 = vld [vmem:[#allocation3 + $0x140] sm:$0xff]  ;;  %v84_v53 = vld [vmem:[#allocation3 + $0x150] sm:$0xff] }
  0x2d   :  { %v87_v54 = vld [vmem:[#allocation3 + $0x168] sm:$0xff]  ;;  %v688_v56 = vpack.c.bf16 %v84_v53, %v82_v52  ;;  %v93_v61 = vld [vmem:[#allocation3 + $0x198] sm:$0xff]  ;;  %v364_v62 = vld [vmem:[%s1076_s5 + $0xf0] sm:$0xff] }
  0x2e   :  { %v365_v63 = vld [vmem:[%s1076_s5 + $0xf8] sm:$0xff]  ;;  %v348_v2 = vld [vmem:[%s1076_s5 + $0x70] sm:$0xff]  ;;  %v97_v11 = vld [vmem:[#allocation3 + $0x1b8] sm:$0xff] }
  0x2f   :  { %727 = vmatpush3.bf16.xpose.msk.msra.mxu1 %vm909_vm1, %v725_v55  ;;  %v89_v55 = vld [vmem:[#allocation3 + $0x178] sm:$0xff]  ;;  %v752_v1 = vpack.c.bf16 %v365_v63, %v364_v62  ;;  %v94_v15 = vld [vmem:[#allocation3 + $0x1a0] sm:$0xff]  ;;  %v96_v16 = vld [vmem:[#allocation3 + $0x1b0] sm:$0xff] }
  0x30   :  { %730 = vmatprep.subr.msk.bf16.mxu1 %vm909_vm1, %v728_v58  ;;  %v690_v57 = vpack.c.bf16 %v89_v55, %v87_v54  ;;  %v86_v58 = vld [vmem:[#allocation3 + $0x160] sm:$0xff]  ;;  %v99_v17 = vld [vmem:[#allocation3 + $0x1c8] sm:$0xff]  ;;  %v700_v19 = vpack.c.bf16 %v96_v16, %v94_v15  ;;  %v104_v28 = vld [vmem:[#allocation3 + $0x1f0] sm:$0xff] }
  0x31   :  { %661 = vmatpush1.bf16.xpose.msra.mxu0 %v660_v47  ;;  %v80_v47 = vld [vmem:[#allocation3 + $0x130] sm:$0xff]  ;;  %v98_v23 = vld [vmem:[#allocation3 + $0x1c0] sm:$0xff] }
  0x32   :  { %663 = vmatprep.subr.bf16.mxu0 %v662_v48  ;;  %v83_v48 = vld [vmem:[#allocation3 + $0x148] sm:$0xff]  ;;  %v684_v50 = vpack.c.bf16 %v80_v47, %v78_v46  ;;  %v102_v27 = vld [vmem:[#allocation3 + $0x1e0] sm:$0xff]  ;;  %v187_v43 = vld [vmem:[%s1073_s2] sm:$0x3]  ;;  %s800_s2 = scalar_lea.vmem %s564_s15, 512 }
  0x33   :  { %v686_v51 = vpack.c.bf16 %v85_v49, %v83_v48  ;;  %v708_v29 = vpack.c.bf16 %v104_v28, %v102_v27  ;;  %p801_p8 = scmp.ne.s32.totalorder %s564_s15, %s800_s2  ;;  %p806_p10 = scmp.lt.s32.totalorder %s800_s2, %s800_s2 }
  0x35   :  { %p807_p11 = por %p806_p10, %p805_p9 }
  0x37   :  { %733 = vmatpush3.bf16.xpose.msk.msra.mxu1 %vm909_vm1, %v731_v5  ;;  %v349_v5 = vld [vmem:[%s1076_s5 + $0x78] sm:$0xff]  ;;  %p808_p12 = pnand %p807_p11, %p801_p8 }
  0x38   :  { %736 = vmatprep.subr.msk.bf16.mxu1 %vm909_vm1, %v734_v8  ;;  %v755_v7 = vpack.c.bf16 %v349_v5, %v348_v2  ;;  %v90_v8 = vld [vmem:[#allocation3 + $0x180] sm:$0xff] }
  0x39   :  { %665 = vmatpush1.bf16.xpose.msra.mxu0 %v664_v59  ;;  %v88_v59 = vld [vmem:[#allocation3 + $0x170] sm:$0xff] }
  0x3a   :  { %667 = vmatprep.subr.bf16.mxu0 %v666_v60  ;;  %v91_v60 = vld [vmem:[#allocation3 + $0x188] sm:$0xff]  ;;  %v692_v0 = vpack.c.bf16 %v88_v59, %v86_v58 }
  0x3b   :  { %v694_v6 = vpack.c.bf16 %v93_v61, %v91_v60 }
  0x3f   :  { %739 = vmatpush3.bf16.xpose.msk.msra.mxu1 %vm909_vm1, %v737_v18  ;;  %v101_v18 = vld [vmem:[#allocation3 + $0x1d8] sm:$0xff] }
  0x40   :  { %742 = vmatprep.subr.msk.bf16.mxu1 %vm909_vm1, %v740_v21  ;;  %v702_v20 = vpack.c.bf16 %v101_v18, %v99_v17  ;;  %v100_v21 = vld [vmem:[#allocation3 + $0x1d0] sm:$0xff] }
  0x41   :  { %669 = vmatpush1.bf16.xpose.msra.mxu0 %v668_v9  ;;  %v92_v9 = vld [vmem:[#allocation3 + $0x190] sm:$0xff]  ;;  %v704_v25 = vpack.c.bf16 %v100_v21, %v98_v23 }
  0x42   :  { %671 = vmatprep.subr.bf16.mxu0 %v670_v10  ;;  %v95_v10 = vld [vmem:[#allocation3 + $0x1a8] sm:$0xff]  ;;  %v696_v12 = vpack.c.bf16 %v92_v9, %v90_v8 }
  0x43   :  { %v698_v13 = vpack.c.bf16 %v97_v11, %v95_v10 }
  0x47   :  { %745 = vmatpush3.bf16.xpose.msk.msra.mxu1 %vm909_vm1, %v743_v31 }
  0x48   :  { %748 = vmatprep.subr.msk.bf16.mxu1 %vm909_vm1, %v746_v34  ;;  %v575_v34 = vld [vmem:[%s1075_s4] ss:$0 sm:$0xff] }
  0x49   :  { %673 = vmatpush1.bf16.xpose.msra.mxu0 %v672_v22  ;;  %v103_v22 = vld [vmem:[#allocation3 + $0x1e8] sm:$0xff] }
  0x4a   :  { %675 = vmatprep.subr.bf16.mxu0 %v674_v24  ;;  %v105_v24 = vld [vmem:[#allocation3 + $0x1f8] sm:$0xff] }
  0x4b   :  { %v706_v26 = vpack.c.bf16 %v105_v24, %v103_v22 }
  0x4f   :  { %751 = vmatpush3.bf16.xpose.msk.msra.mxu1 %vm909_vm1, %v749_v41  ;;  %v190_v41 = vshrl.u32 %v189_v40, 7 }
  0x50   :  { %754 = vmatprep.subr.msk.bf16.mxu1 %vm909_vm1, %v752_v1 }
  0x51   :  { %677 = vmatpush1.bf16.xpose.msra.mxu0 %v676_v35  ;;  %v191_v42 = vsub.s32 0, %v190_v41 }
  0x52   :  { %679 = vmatprep.subr.bf16.mxu0 %v678_v36 }
  0x57   :  { %757 = vmatpush3.bf16.xpose.msk.msra.mxu1 %vm909_vm1, %v755_v7 }
  0x59   :  { %681 = vmatpush1.bf16.xpose.msra.mxu0 %v680_v44  ;;  %v195_v44 = vsub.s32 1, %v190_v41 }
  0x5a   :  { %683 = vmatprep.subr.bf16.mxu0 %v682_v45  ;;  %v192_v45 = vrot.slane %v187_v43, %v191_v42 }
  0x5b   :  { %v196_v46 = vrot.slane %v187_v43, %v195_v44 }
  0x61   :  { %685 = vmatpush1.bf16.xpose.msra.mxu0 %v684_v50 }
  0x62   :  { %687 = vmatprep.subr.bf16.mxu0 %v686_v51 }
  0x69   :  { %689 = vmatpush1.bf16.xpose.msra.mxu0 %v688_v56 }
  0x6a   :  { %691 = vmatprep.subr.bf16.mxu0 %v690_v57 }
  0x71   :  { %693 = vmatpush1.bf16.xpose.msra.mxu0 %v692_v0 }
  0x72   :  { %695 = vmatprep.subr.bf16.mxu0 %v694_v6 }
  0x79   :  { %697 = vmatpush1.bf16.xpose.msra.mxu0 %v696_v12 }
  0x7a   :  { %699 = vmatprep.subr.bf16.mxu0 %v698_v13 }
  0x81   :  { %701 = vmatpush1.bf16.xpose.msra.mxu0 %v700_v19 }
  0x82   :  { %703 = vmatprep.subr.bf16.mxu0 %v702_v20 }
  0x89   :  { %705 = vmatpush1.bf16.xpose.msra.mxu0 %v704_v25 }
  0x8a   :  { %707 = vmatprep.subr.bf16.mxu0 %v706_v26 }
  0x91   :  { %709 = vmatpush1.bf16.xpose.msra.mxu0 %v708_v29 }
  0x98   :  { %171 = vmatmul.mubr.f32.vlgmr.msra.gmra.mrb[0].mxu0 %v892_v3 }
  0x99   :  { %176 = vmatprep.mubr.f32.mxu0 %v897_v4 }
  0x9c   :  { %177 = vmatmul.mubr.f32.gmra.mrb[2].mxu0 %v904_v14 }
  0xeb   :  { %v295_v30 = vpop.f32.mrb[0].mxu1 }
  0xec   :  { %308 = vst.msk [vmem:[#allocation2] sm:$0xff] %vm307_vm0, %v295_v30  ;;  %v297_v31 = vpop.f32.mrb[1].mxu1 }
  0xef   :  { %v300_v32 = vpop.f32.mrb[2].mxu1 }
  0xf0   :  { %309 = vst.msk [vmem:[#allocation2 + $0x8] sm:$0xff] %vm307_vm0, %v300_v32  ;;  %v302_v33 = vpop.f32.mrb[3].mxu1 }
  0xf3   :  { %v323_v35 = vld [vmem:[#allocation2] sm:$0xff] }
  0xf4   :  { %v332_v36 = vmul.f32 %v575_v34, %v323_v35 }
  0xf6   :  { %642 = vmatprep.mubr.msk.f32.mxu1 %vm307_vm0, %v332_v36 }
  0xf7   :  { %643 = vmatmul.mubr.msk.f32.vlgmr.msra.gmra.mrb[4].mxu1 %vm307_vm0, %v332_v36  ;;  %v324_v3 = vld [vmem:[#allocation2 + $0x8] sm:$0xff] }
  0xf8   :  { %v333_v4 = vmul.f32 %v575_v34, %v324_v3 }
  0xfa   :  { %644 = vmatprep.mubr.msk.f32.mxu1 %vm307_vm0, %v333_v4 }
  0xfb   :  { %645 = vmatmul.mubr.msk.f32.gmra.mrb[6].mxu1 %vm307_vm0, %v333_v4 }
 0x16b   :  { %v172_v14 = vpop.f32.mrb[0].mxu0 }
 0x16c   :  { %v174_v37 = vpop.f32.mrb[1].mxu0  ;;  %v199_v47 = vadd.f32 %v192_v45, %v172_v14 }
 0x16d   :  { %v200_v48 = vadd.f32 %v196_v46, %v174_v37 }
 0x16f   :  { %v178_v38 = vpop.f32.mrb[2].mxu0 }
 0x170   :  { %v180_v39 = vpop.f32.mrb[3].mxu0  ;;  %v201_v50 = vadd.f32 %v192_v45, %v178_v38 }
 0x171   :  { %v202_v53 = vadd.f32 %v196_v46, %v180_v39 }
 0x1ca   :  { %v535_v49 = vpop.f32.mrb[4].mxu1 }
 0x1cb   :  { %v761_v51 = vadd.f32 %v535_v49, %v199_v47  ;;  %v537_v52 = vpop.f32.mrb[5].mxu1 }
 0x1cc   :  { %v765_v54 = vadd.f32 %v537_v52, %v200_v48 }
 0x1cd   :  { %554 = vst [vmem:[#allocation6] sm:$0xff] %v761_v51 }
 0x1ce   :  { %555 = vst [vmem:[#allocation6 + $0x8] sm:$0xff] %v765_v54  ;;  %v541_v55 = vpop.f32.mrb[6].mxu1 }
 0x1cf   :  { %v769_v56 = vadd.f32 %v541_v55, %v201_v50  ;;  %v543_v57 = vpop.f32.mrb[7].mxu1 }
 0x1d0   :  { %v773_v58 = vadd.f32 %v543_v57, %v202_v53 }
 0x1d1   :  { %556 = vst [vmem:[#allocation6 + $0x10] sm:$0xff] %v769_v56 }
 0x1d2   :  { %557 = vst [vmem:[#allocation6 + $0x18] sm:$0xff] %v773_v58 }
 0x1d3   :  { %811 = shalt.err (!%p808_p12)
}
 0x1d4   :  { %s812_s18 = scalar_lea.hbm %s1077_s6, 512 }
 0x1d5   :  { %p813_p13 = scmp.ne.s32.totalorder %s1077_s6, %s812_s18  ;;  %p816_p0 = scmp.lt.u32.totalorder %s812_s18, %s1077_s6 }
 0x1d7   :  { %p818_p1 = pnand %p816_p0, %p813_p13 }
 0x1d9   :  { %821 = shalt.err (!%p818_p1)
}
 0x1da   :  { %569 = dma.vmem_to_hbm [thread:$0]  %s564_s15, 512, %s1077_s6, [#allocation5], %s827_s7, %s827_s7, %s828_s8  }
 0x1db   :  { %824 = dma.done.wait [#allocation5], 512  }
 0x1dc   :  { %825 = vsyncadd [#allocation5], 4294966784 }
 0x1dd   :  { %573 = vsyncpa [#allocation4], 1 }
 0x1de   :  { %574 = vsyncpa [#allocation5], 1 }

</bundles_post_ra>
